<compile_context>
chip_gen: v7x
topology: tpu7x:2x2x1
jax: 0.10.0
libtpu: 0.0.40
codegen_flags: <defaults>
</compile_context>

<pallas_src>
import math

import jax
import jax.numpy as jnp
from jax.experimental import pallas as pl
from jax.experimental.pallas import tpu as pltpu

_MIB = 1 << 20


def _build_pe(d_model: int, max_len: int = 5000) -> jnp.ndarray:
    """Sinusoidal positional-encoding table (max_len, d_model); handles odd d_model."""
    position = jnp.arange(0, max_len, dtype=jnp.float32)[:, None]            # (L, 1)
    div_term = jnp.exp(
        jnp.arange(0, d_model, 2, dtype=jnp.float32) * (-math.log(10000.0) / d_model)
    )                                                                         # (ceil(D/2),)
    angles = position * div_term                                              # (L, ceil(D/2))
    pe = jnp.zeros((max_len, d_model), dtype=jnp.float32)
    pe = pe.at[:, 0::2].set(jnp.sin(angles))
    pe = pe.at[:, 1::2].set(jnp.cos(angles)[:, : d_model // 2])
    return pe


def _vmem_capacity_bytes() -> int:
    try:
        return int(pltpu.get_tpu_info().vmem_capacity_bytes)
    except Exception:
        return 64 * _MIB  # conservative fallback (v7x per-TC)


def _budgets():
    """(target_block_bytes, max_block_bytes, usable_vmem_bytes) for x blocks."""
    cap = _vmem_capacity_bytes()
    target = 8 * _MIB
    max_block = 16 * _MIB if cap >= 100 * _MIB else 8 * _MIB
    usable = max(16 * _MIB, cap - 16 * _MIB)          # leave compiler headroom
    max_block = min(max_block, usable // 5)           # 2x(in)+2x(out)+pe must fit
    return target, max_block, usable


def _choose_rows(S: int, row_bytes: int, target_bytes: int, max_bytes: int) -> int:
    """Sequence rows per block: ~target_bytes of x, multiple of 8, block <= max_bytes,
    and keep >= ~4 grid steps along S (2 per v7x TensorCore) when S allows it."""
    if S <= 8:
        return S
    ts = max(8, (min(S, target_bytes // max(row_bytes, 1)) // 8) * 8)
    while ts > 8 and ts * row_bytes > max_bytes:
        ts -= 8
    if S >= 32:
        ts = min(ts, max(8, ((S // 4) // 8) * 8))
    return min(ts, S)


def _vmem_limit(x_block_bytes: int, pe_block_bytes: int, usable: int) -> int:
    # double-buffered input + output + pe, plus slack, clamped to physical VMEM
    need = 2 * (2 * x_block_bytes + pe_block_bytes) + 2 * _MIB
    return int(min(max(need, 16 * _MIB), usable))


# ---------------------------------------------------------------------------
# 3D path: D % 128 == 0 and B % 8 == 0 -> native (ts, B, td) blocks.
# ---------------------------------------------------------------------------
def _pe_add_3d_kernel(x_ref, pe_ref, o_ref):
    # x_ref: (ts, B, td); pe_ref: (ts, td) broadcast over the batch axis in VMEM.
    o_ref[...] = x_ref[...] + pe_ref[...][:, None, :]


def _pe_add_3d(x, pe_s):
    S, B, D = x.shape
    itemsize = jnp.dtype(x.dtype).itemsize
    target, max_block, usable = _budgets()
    # Split D only when even an 8-row slab would blow the per-block budget
    # (keeps double-buffering alive on v7x's smaller VMEM); elementwise along D
    # so no extra HBM traffic.
    td = D
    if 8 * B * D * itemsize > max_block:
        td = max(128, ((max_block // (8 * B * itemsize)) // 128) * 128)
        td = min(td, D)
    row_bytes = B * td * itemsize
    ts = _choose_rows(S, row_bytes, target, max_block)
    x_block = ts * row_bytes
    pe_block = ts * td * itemsize
    return pl.pallas_call(
        _pe_add_3d_kernel,
        out_shape=jax.ShapeDtypeStruct((S, B, D), x.dtype),
        grid=(pl.cdiv(S, ts), pl.cdiv(D, td)),
        in_specs=[
            pl.BlockSpec((ts, B, td), lambda i, k: (i, 0, k)),
            pl.BlockSpec((ts, td), lambda i, k: (i, k)),
        ],
        out_specs=pl.BlockSpec((ts, B, td), lambda i, k: (i, 0, k)),
        compiler_params=pltpu.CompilerParams(
            dimension_semantics=("parallel", "parallel"),
            vmem_limit_bytes=_vmem_limit(x_block, pe_block, usable),
        ),
    )(x, pe_s)


# ---------------------------------------------------------------------------
# Flattened path: D % 128 != 0 or B % 8 != 0 -> (S, B*D) lane/sublane-dense
# blocks with the batch replication of pe done inside the kernel (in VMEM).
# ---------------------------------------------------------------------------
def _make_pe_add_2d_kernel(nb: int):
    def kernel(x_ref, pe_ref, o_ref):
        pe = pe_ref[...]                                   # (ts, D)
        if nb > 1:
            # Column layout of the flattened x block is b*D + d, so replicating
            # pe nb times along lanes matches it exactly. The kernel is DMA-bound
            # (VPU/XLU slack is huge), so this concat is effectively free and
            # avoids materializing a full (S, B*D) pe array in HBM.
            pe = jnp.concatenate([pe] * nb, axis=-1)       # (ts, nb*D)
        o_ref[...] = x_ref[...] + pe
    return kernel


def _pe_add_2d(x, pe_s):
    S, B, D = x.shape
    W = B * D
    itemsize = jnp.dtype(x.dtype).itemsize
    target, max_block, usable = _budgets()
    # Optional width tiling: a width tile must be a multiple of both D (pe period)
    # and 128 (lane tiling). Only split when that is possible and needed.
    nb, tw = B, W
    if 8 * W * itemsize > max_block:
        unit = (128 * D) // math.gcd(128, D)               # lcm(D, 128)
        if unit < W:
            max_w = max(unit, ((max_block // (8 * itemsize)) // unit) * unit)
            tw = min(max_w, W)
            nb = tw // D
    row_bytes = tw * itemsize
    ts = _choose_rows(S, row_bytes, target, max_block)
    x_block = ts * row_bytes
    pe_block = ts * D * itemsize

    x2 = x.reshape(S, W)                                   # contiguous collapse (free)
    out2 = pl.pallas_call(
        _make_pe_add_2d_kernel(nb),
        out_shape=jax.ShapeDtypeStruct((S, W), x.dtype),
        grid=(pl.cdiv(S, ts), pl.cdiv(W, tw)),
        in_specs=[
            pl.BlockSpec((ts, tw), lambda i, k: (i, k)),
            pl.BlockSpec((ts, D), lambda i, k: (i, 0)),
        ],
        out_specs=pl.BlockSpec((ts, tw), lambda i, k: (i, k)),
        compiler_params=pltpu.CompilerParams(
            dimension_semantics=("parallel", "parallel"),
            vmem_limit_bytes=_vmem_limit(x_block, pe_block, usable),
        ),
    )(x2, pe_s)
    return out2.reshape(S, B, D)


@jax.jit
def positional_encoding_forward(x: jnp.ndarray, pe: jnp.ndarray) -> jnp.ndarray:
    """x: (S, B, D); pe: (max_len, D). Returns x + pe[:S] broadcast over batch."""
    S, B, D = x.shape
    # pe is sliced and cast to x.dtype once (halves pe DMA for bf16 x). For fp32 x
    # (the common case and the test below) this matches PyTorch bit-for-bit; for a
    # bf16 x, PyTorch would promote the result to fp32 instead.
    pe_s = pe[:S].astype(x.dtype)
    if D % 128 == 0 and B % 8 == 0:
        return _pe_add_3d(x, pe_s)     # already lane- and sublane-dense
    return _pe_add_2d(x, pe_s)         # flatten (B, D) for dense stores


if __name__ == "__main__":
    key = jax.random.PRNGKey(0)

    # --- small shape: D % 128 != 0 -> flattened path with in-kernel pe broadcast ---
    S, B, D = 8, 2, 32
    max_len = 64  # semantics identical to max_len=5000 for S <= 64
    x = jax.random.normal(key, (S, B, D), dtype=jnp.float32)
    pe = _build_pe(D, max_len)
    out = jax.block_until_ready(positional_encoding_forward(x, pe))
    ref = x + pe[:S][:, None, :]
    assert out.shape == (S, B, D)
    assert jnp.allclose(out, ref, atol=1e-6), "mismatch vs reference (2D path, small D)"

    # --- D % 128 == 0 but B % 8 != 0 -> also routed through the flattened path ---
    S2, B2, D2 = 16, 2, 128
    x2 = jax.random.normal(jax.random.PRNGKey(1), (S2, B2, D2), dtype=jnp.float32)
    pe2 = _build_pe(D2, 64)
    out2 = jax.block_until_ready(positional_encoding_forward(x2, pe2))
    ref2 = x2 + pe2[:S2][:, None, :]
    assert out2.shape == (S2, B2, D2)
    assert jnp.allclose(out2, ref2, atol=1e-6), "mismatch vs reference (2D path, small B)"

    # --- D % 128 == 0 and B % 8 == 0 -> native 3D path, grid kept >= 4 along S ---
    S3, B3, D3 = 32, 8, 128
    x3 = jax.random.normal(jax.random.PRNGKey(2), (S3, B3, D3), dtype=jnp.float32)
    pe3 = _build_pe(D3, 64)
    out3 = jax.block_until_ready(positional_encoding_forward(x3, pe3))
    ref3 = x3 + pe3[:S3][:, None, :]
    assert out3.shape == (S3, B3, D3)
    assert jnp.allclose(out3, ref3, atol=1e-6), "mismatch vs reference (3D path)"

    print("KERNEL_OK")
</pallas_src>

<mosaic_0001>
module attributes {stable_mosaic.version = 11 : i64} {
  func.func @kernel(%arg0: i32, %arg1: i32, %arg2: memref<8x64xf32, #tpu.memory_space<vmem>>, %arg3: memref<8x32xf32, #tpu.memory_space<vmem>>, %arg4: memref<8x64xf32, #tpu.memory_space<vmem>>) attributes {dimension_semantics = [#tpu.dimension_semantics<parallel>, #tpu.dimension_semantics<parallel>], iteration_bounds = array<i64: 1, 1>, scalar_prefetch = 0 : i64, scratch_operands = 0 : i64, tpu.core_type = #tpu.core_type<tc>, window_params = [{transform_indices = @transform_0, window_bounds = array<i64: 8, 64>}, {transform_indices = @transform_1, window_bounds = array<i64: 8, 32>}, {transform_indices = @transform_2, window_bounds = array<i64: 8, 64>}]} {
    %c0 = arith.constant 0 : index
    %c0_0 = arith.constant 0 : index
    %0 = vector.load %arg3[%c0, %c0_0] : memref<8x32xf32, #tpu.memory_space<vmem>>, vector<8x32xf32>
    %1 = tpu.concatenate %0, %0 in 1 : vector<8x32xf32>, vector<8x32xf32> -> vector<8x64xf32>
    %c0_1 = arith.constant 0 : index
    %c0_2 = arith.constant 0 : index
    %2 = vector.load %arg2[%c0_1, %c0_2] : memref<8x64xf32, #tpu.memory_space<vmem>>, vector<8x64xf32>
    %3 = arith.addf %2, %1 : vector<8x64xf32>
    %c0_3 = arith.constant 0 : index
    %c0_4 = arith.constant 0 : index
    %4 = vector.load %arg4[%c0_3, %c0_4] : memref<8x64xf32, #tpu.memory_space<vmem>>, vector<8x64xf32>
    tpu.vector_store %arg4[%c0_3, %c0_4], %3 {strides = array<i32>} : memref<8x64xf32, #tpu.memory_space<vmem>>, vector<8x64xf32>,
    return
  }
  func.func @transform_0(%arg0: i32, %arg1: i32) -> (i32, i32) {
    %c0_i32 = arith.constant 0 : i32
    return %arg0, %arg1 : i32, i32
  }
  func.func @transform_1(%arg0: i32, %arg1: i32) -> (i32, i32) {
    %c0_i32 = arith.constant 0 : i32
    %c0_i32_0 = arith.constant 0 : i32
    return %arg0, %c0_i32 : i32, i32
  }
  func.func @transform_2(%arg0: i32, %arg1: i32) -> (i32, i32) {
    %c0_i32 = arith.constant 0 : i32
    return %arg0, %arg1 : i32, i32
  }
}

</mosaic_0001>

<bundles_post_ra>
// kernel: positional_encoding_forward.1
= control target key start
LH: loop header
LB: loop body
LE: loop exit
PB: predicated region body
PF: predicated region fallthrough
CT: control target
= control target key end

     0   :  { %s27_s11 = smov 32   ;;  %vm16_vm0 = vcmask 261120   ;;  %vm20_vm1 = vcmask 523264   ;;  %s52_s1 = inlined_call_operand.vmem [shape: f32[8,32], index: 1, kind: input, shape index: {}]   ;;  %s53_s0 = inlined_call_operand.vmem [shape: f32[8,64], index: 0, kind: input, shape index: {}]   ;;  %s54_s2 = inlined_call_operand.vmem [shape: f32[8,64], index: 2, kind: output, shape index: {}]  }
   0x1   :  { %v11_v0 = vld [vmem:[%s52_s1] sm:$0xff] }
   0x2   :  { %13 = vrot.lane.b32.xlu0 %v11_v0, %s27_s11  ;;  %v18_v1 = vld [vmem:[%s53_s0] sm:$0xff] }
  0x74   :  { %v14_v2 = vpop.permute.xlu0 %13 }
  0x75   :  { %v17_v3 = vsel %vm16_vm0, %v11_v0, %v14_v2 }
  0x76   :  { %v19_v4 = vadd.f32 %v18_v1, %v17_v3 }
  0x78   :  { %21 = vst.msk [vmem:[%s54_s2] sm:$0xff] %vm20_vm1, %v19_v4 }

</bundles_post_ra>
